<compile_context>
chip_gen: v6e
topology: v6e:2x2x1
jax: 0.10.0
libtpu: 0.0.40
codegen_flags: <defaults>
</compile_context>

<pallas_src>
import functools

import jax
import jax.numpy as jnp
from jax.experimental import pallas as pl
from jax.experimental.pallas import tpu as pltpu

MARGIN = 1.0

_LANE = 128
_MIB = 1024 * 1024
# Never let the pipelined tile footprint exceed this, even on 128 MiB-VMEM
# chips: keeps identical code safe on v7x (64 MiB physical VMEM per TC) and
# still sits inside the recommended 48-64 MiB range for v6e/v5e.
_MAX_TILE_BUDGET_BYTES = 48 * _MIB
_FALLBACK_VMEM_BYTES = 64 * _MIB     # most conservative physical VMEM (v7x per-TC)
_VMEM_HEADROOM_BYTES = 8 * _MIB      # Mosaic internal scratch / misc
_MIN_SCOPED_VMEM_BYTES = 32 * _MIB   # never request less than the usual default
_MIN_MEGACORE_TILES = 4              # keep >=4 grid steps so both v7x TCs work


def _round_up(x, m):
    return ((x + m - 1) // m) * m


def _round_down(x, m):
    return (x // m) * m


def _sublane_rows(itemsize):
    # Physical sublane packing: f32 -> 8 rows, bf16 -> 16, int8/fp8 -> 32.
    return {4: 8, 2: 16, 1: 32}.get(itemsize, 8)


def _physical_vmem_bytes():
    try:
        return int(pltpu.get_tpu_info().vmem_capacity_bytes)
    except Exception:
        return _FALLBACK_VMEM_BYTES


def _triplet_loss_kernel(a_ref, p_ref, n_ref, loss_ref, *, margin):
    # One (TB, D) tile of each input per grid step; compute in f32 regardless
    # of storage dtype (bf16 inputs are upcast here — compute is free, the
    # kernel is HBM-bandwidth bound, and f32 diffs keep full bf16 accuracy).
    a = a_ref[...].astype(jnp.float32)
    p = p_ref[...].astype(jnp.float32)
    n = n_ref[...].astype(jnp.float32)

    diff_p = a - p
    diff_n = a - n
    # Per-row L2 norms over the feature (lane) axis, keepdims -> (TB, 1).
    dist_p = jnp.sqrt(jnp.sum(diff_p * diff_p, axis=1, keepdims=True))
    dist_n = jnp.sqrt(jnp.sum(diff_n * diff_n, axis=1, keepdims=True))

    # relu(dp - dn + margin); rows past the true batch (partial last tile) may
    # hold padding garbage but their writeback is masked by Pallas, and no
    # cross-row reduction happens in-kernel, so valid rows are unaffected.
    loss_ref[...] = jnp.maximum(dist_p - dist_n + margin, 0.0)


def _plan_tiling(B, D, itemsize, block_rows, input_buffers):
    """Pick the batch-tile TB and a matching explicit scoped-VMEM limit."""
    sublane = _sublane_rows(itemsize)
    cap = _physical_vmem_bytes()

    # Physical (lane/sublane-padded) VMEM bytes per live batch row:
    #   3 inputs x input_buffers x round_up(D,128) x itemsize
    # + 2 output buffers x 128 lanes x 4B  (the (TB,1) f32 block pads to 128 lanes)
    in_row_bytes = 3 * input_buffers * _round_up(D, _LANE) * itemsize
    out_row_bytes = 2 * _LANE * 4
    row_bytes = in_row_bytes + out_row_bytes

    if block_rows is not None:
        tb = max(sublane, _round_up(int(block_rows), sublane))
    else:
        budget = min(_MAX_TILE_BUDGET_BYTES, int(cap * 0.6))
        tb = max(sublane, _round_down(budget // row_bytes, sublane))
        # TODO(synk): for extremely large D (where even TB=sublane exceeds the
        # budget), also tile the feature axis with a running sum-of-squares
        # scratch instead of growing the VMEM limit further.

        # Keep >= _MIN_MEGACORE_TILES grid steps (when B allows) so the
        # "parallel" batch axis actually shards across v7x's two TensorCores.
        # Harmless on single-TC v5e/v6e.
        if B >= _MIN_MEGACORE_TILES * sublane:
            tb = min(tb, max(sublane,
                             _round_down(pl.cdiv(B, _MIN_MEGACORE_TILES), sublane)))
        # Never use a tile bigger than the (sublane-aligned) batch itself.
        tb = min(tb, _round_up(B, sublane))

    footprint = row_bytes * tb
    vmem_limit = int(min(cap, max(_MIN_SCOPED_VMEM_BYTES,
                                  footprint + _VMEM_HEADROOM_BYTES)))
    return tb, vmem_limit


def triplet_loss(anchor, positive, negative, *, margin=MARGIN, size_average=True,
                 block_rows=None, input_buffers=2):
    """Pallas TPU implementation of TripletLoss.forward. Inputs: (B, D)."""
    assert anchor.shape == positive.shape == negative.shape
    assert anchor.dtype == positive.dtype == negative.dtype
    assert anchor.ndim == 2, "expected (B, D) inputs"
    B, D = anchor.shape

    itemsize = jnp.dtype(anchor.dtype).itemsize
    tb, vmem_limit = _plan_tiling(B, D, itemsize, block_rows, input_buffers)
    num_tiles = pl.cdiv(B, tb)

    kernel = functools.partial(_triplet_loss_kernel, margin=float(margin))

    if input_buffers == 2:
        in_spec = pl.BlockSpec((tb, D), lambda i: (i, 0))
    else:
        # Deeper pipelining knob (e.g. Buffered(3) on v7x with small tiles);
        # the extra buffer is accounted for in _plan_tiling's byte math.
        in_spec = pl.BlockSpec((tb, D), lambda i: (i, 0),
                               pipeline_mode=pl.Buffered(input_buffers))
    out_spec = pl.BlockSpec((tb, 1), lambda i: (i, 0))

    cost = pl.CostEstimate(
        flops=int(6 * B * D + 4 * B),            # 2 subs, 2 muls, 2 adds per elem
        transcendentals=int(2 * B),              # 2 sqrt per row
        bytes_accessed=int(3 * B * D * itemsize + 4 * B),
    )

    per_row_losses = pl.pallas_call(
        kernel,
        out_shape=jax.ShapeDtypeStruct((B, 1), jnp.float32),
        grid=(num_tiles,),
        in_specs=[in_spec, in_spec, in_spec],
        out_specs=out_spec,
        compiler_params=pltpu.CompilerParams(
            dimension_semantics=("parallel",),   # tiles independent, no accumulator
            vmem_limit_bytes=vmem_limit,
        ),
        cost_estimate=cost,
    )(anchor, positive, negative)

    losses = per_row_losses[:, 0]
    return jnp.mean(losses) if size_average else jnp.sum(losses)


def _triplet_loss_ref(anchor, positive, negative, margin=MARGIN, size_average=True):
    dp = jnp.linalg.norm(anchor - positive, axis=1)
    dn = jnp.linalg.norm(anchor - negative, axis=1)
    losses = jax.nn.relu(dp - dn + margin)
    return jnp.mean(losses) if size_average else jnp.sum(losses)


if __name__ == "__main__":
    key = jax.random.PRNGKey(0)
    k_a, k_p, k_n = jax.random.split(key, 3)

    # Small, TPU-friendly demo shapes: batch=24, feature dim=128.
    B, D = 24, 128
    anchor = jax.random.normal(k_a, (B, D), dtype=jnp.float32)
    positive = jax.random.normal(k_p, (B, D), dtype=jnp.float32)
    negative = jax.random.normal(k_n, (B, D), dtype=jnp.float32)

    # Mean reduction.
    out = triplet_loss(anchor, positive, negative, margin=MARGIN, size_average=True)
    jax.block_until_ready(out)
    ref = _triplet_loss_ref(anchor, positive, negative, MARGIN, True)
    assert jnp.allclose(out, ref, rtol=1e-5, atol=1e-5), (out, ref)

    # Sum reduction.
    out_sum = triplet_loss(anchor, positive, negative, margin=MARGIN, size_average=False)
    jax.block_until_ready(out_sum)
    ref_sum = _triplet_loss_ref(anchor, positive, negative, MARGIN, False)
    assert jnp.allclose(out_sum, ref_sum, rtol=1e-5, atol=1e-5), (out_sum, ref_sum)

    # Multi-tile grid + ragged last block (B % block_rows != 0) exercises the
    # pipelined / partial-block path.
    B2 = 40
    a2 = jax.random.normal(jax.random.PRNGKey(1), (B2, D), dtype=jnp.float32)
    p2 = jax.random.normal(jax.random.PRNGKey(2), (B2, D), dtype=jnp.float32)
    n2 = jax.random.normal(jax.random.PRNGKey(3), (B2, D), dtype=jnp.float32)
    out2 = triplet_loss(a2, p2, n2, margin=MARGIN, size_average=True, block_rows=16)
    jax.block_until_ready(out2)
    ref2 = _triplet_loss_ref(a2, p2, n2, MARGIN, True)
    assert jnp.allclose(out2, ref2, rtol=1e-5, atol=1e-5), (out2, ref2)

    # Auto-tiled multi-step path (exercises the megacore min-tile rule).
    out2b = triplet_loss(a2, p2, n2, margin=MARGIN, size_average=False)
    jax.block_until_ready(out2b)
    ref2b = _triplet_loss_ref(a2, p2, n2, MARGIN, False)
    assert jnp.allclose(out2b, ref2b, rtol=1e-5, atol=1e-5), (out2b, ref2b)

    # bf16 storage (halves HBM traffic on this bandwidth-bound op, biggest win
    # on v5e); kernel upcasts to f32 internally.
    a3 = anchor.astype(jnp.bfloat16)
    p3 = positive.astype(jnp.bfloat16)
    n3 = negative.astype(jnp.bfloat16)
    out3 = triplet_loss(a3, p3, n3, margin=MARGIN, size_average=True)
    jax.block_until_ready(out3)
    ref3 = _triplet_loss_ref(a3.astype(jnp.float32), p3.astype(jnp.float32),
                             n3.astype(jnp.float32), MARGIN, True)
    assert jnp.allclose(out3, ref3, rtol=1e-4, atol=1e-4), (out3, ref3)

    print("KERNEL_OK")
</pallas_src>

<mosaic_0001>
module attributes {stable_mosaic.version = 11 : i64} {
  func.func @_triplet_loss_kernel(%arg0: i32, %arg1: memref<24x128xf32, #tpu.memory_space<vmem>>, %arg2: memref<24x128xf32, #tpu.memory_space<vmem>>, %arg3: memref<24x128xf32, #tpu.memory_space<vmem>>, %arg4: memref<24x1xf32, #tpu.memory_space<vmem>>) attributes {dimension_semantics = [#tpu.dimension_semantics<parallel>], iteration_bounds = array<i64: 1>, scalar_prefetch = 0 : i64, scratch_operands = 0 : i64, tpu.core_type = #tpu.core_type<tc>, window_params = [{transform_indices = @transform_0, window_bounds = array<i64: 24, 128>}, {transform_indices = @transform_1, window_bounds = array<i64: 24, 128>}, {transform_indices = @transform_2, window_bounds = array<i64: 24, 128>}, {transform_indices = @transform_3, window_bounds = array<i64: 24, 1>}]} {
    %c0 = arith.constant 0 : index
    %c0_0 = arith.constant 0 : index
    %0 = vector.load %arg1[%c0, %c0_0] : memref<24x128xf32, #tpu.memory_space<vmem>>, vector<24x128xf32>
    %c0_1 = arith.constant 0 : index
    %c0_2 = arith.constant 0 : index
    %1 = vector.load %arg2[%c0_1, %c0_2] : memref<24x128xf32, #tpu.memory_space<vmem>>, vector<24x128xf32>
    %c0_3 = arith.constant 0 : index
    %c0_4 = arith.constant 0 : index
    %2 = vector.load %arg3[%c0_3, %c0_4] : memref<24x128xf32, #tpu.memory_space<vmem>>, vector<24x128xf32>
    %3 = arith.subf %0, %1 : vector<24x128xf32>
    %4 = arith.subf %0, %2 : vector<24x128xf32>
    %5 = arith.mulf %3, %3 : vector<24x128xf32>
    %cst = arith.constant dense<0.000000e+00> : vector<24xf32>
    %6 = vector.multi_reduction <add>, %5, %cst [1] : vector<24x128xf32> to vector<24xf32>
    %7 = vector.shape_cast %6 : vector<24xf32> to vector<24x1xf32>
    %8 = math.sqrt %7 : vector<24x1xf32>
    %9 = arith.mulf %4, %4 : vector<24x128xf32>
    %cst_5 = arith.constant dense<0.000000e+00> : vector<24xf32>
    %10 = vector.multi_reduction <add>, %9, %cst_5 [1] : vector<24x128xf32> to vector<24xf32>
    %11 = vector.shape_cast %10 : vector<24xf32> to vector<24x1xf32>
    %12 = math.sqrt %11 : vector<24x1xf32>
    %13 = arith.subf %8, %12 : vector<24x1xf32>
    %cst_6 = arith.constant 1.000000e+00 : f32
    %14 = vector.broadcast %cst_6 : f32 to vector<24x1xf32>
    %15 = arith.addf %13, %14 : vector<24x1xf32>
    %cst_7 = arith.constant 0.000000e+00 : f32
    %16 = vector.broadcast %cst_7 : f32 to vector<24x1xf32>
    %17 = arith.maximumf %15, %16 : vector<24x1xf32>
    %c0_8 = arith.constant 0 : index
    %c0_9 = arith.constant 0 : index
    %18 = vector.load %arg4[%c0_8, %c0_9] : memref<24x1xf32, #tpu.memory_space<vmem>>, vector<24x1xf32>
    tpu.vector_store %arg4[%c0_8, %c0_9], %17 {strides = array<i32>} : memref<24x1xf32, #tpu.memory_space<vmem>>, vector<24x1xf32>,
    return
  }
  func.func @transform_0(%arg0: i32) -> (i32, i32) {
    %c0_i32 = arith.constant 0 : i32
    %c0_i32_0 = arith.constant 0 : i32
    return %arg0, %c0_i32 : i32, i32
  }
  func.func @transform_1(%arg0: i32) -> (i32, i32) {
    %c0_i32 = arith.constant 0 : i32
    %c0_i32_0 = arith.constant 0 : i32
    return %arg0, %c0_i32 : i32, i32
  }
  func.func @transform_2(%arg0: i32) -> (i32, i32) {
    %c0_i32 = arith.constant 0 : i32
    %c0_i32_0 = arith.constant 0 : i32
    return %arg0, %c0_i32 : i32, i32
  }
  func.func @transform_3(%arg0: i32) -> (i32, i32) {
    %c0_i32 = arith.constant 0 : i32
    %c0_i32_0 = arith.constant 0 : i32
    return %arg0, %c0_i32 : i32, i32
  }
}

</mosaic_0001>

<bundles_post_ra>
// kernel: tpu_custom_call.1
= control target key start
LH: loop header
LB: loop body
LE: loop exit
PB: predicated region body
PF: predicated region fallthrough
CT: control target
= control target key end

     0   :  { %8 = vsyncpa [#allocation3], 0  ;;  %s279_s0 = inlined_call_operand.hbm [shape: f32[24,128], index: 0, kind: input, shape index: {}]   ;;  %s280_s1 = inlined_call_operand.hbm [shape: f32[24,128], index: 1, kind: input, shape index: {}]   ;;  %s281_s2 = inlined_call_operand.hbm [shape: f32[24,128], index: 2, kind: input, shape index: {}]   ;;  %s282_s3 = inlined_call_operand.vmem [shape: f32[24,1], index: 3, kind: output, shape index: {}]  }
   0x1   :  { %9 = vsyncpa [#allocation5], 0  ;;  %s230_s12 = smov [#allocation4]   ;;  %s231_s14 = smov [#allocation2]  }
   0x2   :  { %s27_s13 = sshll.u32 %s230_s12, 4  ;;  %s15_s15 = sshll.u32 %s231_s14, 4  ;;  %s28_s13 = int_to_ptr.vmem [resolvable:$true] %s27_s13  ;;  %s16_s15 = int_to_ptr.vmem [resolvable:$true] %s15_s15 }
   0x3   :  { %s174_s16 = scalar_lea.vmem %s28_s13, 384  ;;  %p179_p1 = scmp.lt.s32.totalorder %s28_s13, %s28_s13 }
   0x4   :  { %p175_p0 = scmp.ne.s32.totalorder %s28_s13, %s174_s16  ;;  %p180_p2 = scmp.lt.s32.totalorder %s174_s16, %s174_s16 }
   0x6   :  { %p181_p3 = por %p180_p2, %p179_p1 }
   0x8   :  { %p182_p4 = pnand %p181_p3, %p175_p0 }
   0xa   :  { %185 = shalt.err (!%p182_p4)
}
   0xb   :  { %s232_s17 = smov 128   ;;  %s233_s18 = smov 8  }
   0xc   :  { %33 = dma.hbm_to_vmem [thread:$0]  %s280_s1, 384, %s28_s13, [#allocation5], %s232_s17, %s232_s17, %s233_s18  }
   0xd   :  { %s194_s21 = scalar_lea.vmem %s16_s15, 384  ;;  %p199_p6 = scmp.lt.s32.totalorder %s16_s15, %s16_s15 }
   0xe   :  { %p195_p5 = scmp.ne.s32.totalorder %s16_s15, %s194_s21  ;;  %p200_p7 = scmp.lt.s32.totalorder %s194_s21, %s194_s21 }
  0x10   :  { %p201_p8 = por %p200_p7, %p199_p6 }
  0x12   :  { %p202_p9 = pnand %p201_p8, %p195_p5 }
  0x14   :  { %205 = shalt.err (!%p202_p9)
}
  0x15   :  { %21 = dma.hbm_to_vmem [thread:$0]  %s279_s0, 384, %s16_s15, [#allocation3], %s232_s17, %s232_s17, %s233_s18  }
  0x16   :  { %s234_s24 = smov [#allocation6]  }
  0x17   :  { %s39_s25 = sshll.u32 %s234_s24, 4  ;;  %s40_s25 = int_to_ptr.vmem [resolvable:$true] %s39_s25 }
  0x18   :  { %s214_s26 = scalar_lea.vmem %s40_s25, 384  ;;  %p219_p11 = scmp.lt.s32.totalorder %s40_s25, %s40_s25 }
  0x19   :  { %p215_p10 = scmp.ne.s32.totalorder %s40_s25, %s214_s26  ;;  %p220_p12 = scmp.lt.s32.totalorder %s214_s26, %s214_s26 }
  0x1b   :  { %p221_p13 = por %p220_p12, %p219_p11 }
  0x1d   :  { %p222_p0 = pnand %p221_p13, %p215_p10 }
  0x1f   :  { %225 = shalt.err (!%p222_p0)
}
  0x20   :  { %45 = dma.hbm_to_vmem [thread:$0]  %s281_s2, 384, %s40_s25, [#allocation5], %s232_s17, %s232_s17, %s233_s18  }
  0x21   :  { %226 = dma.done.wait [#allocation3], 384  }
  0x22   :  { %227 = vsyncadd [#allocation3], 4294966912 }
  0x23   :  { %228 = dma.done.wait [#allocation5], 768  }
  0x24   :  { %229 = vsyncadd [#allocation5], 4294966528  ;;  %v57_v0 = vld [vmem:[#allocation2 + $0x10] sm:$0xff]  ;;  %v60_v1 = vld [vmem:[#allocation4 + $0x10] sm:$0xff]  ;;  %vm139_vm3 = vcmask 7168  }
  0x25   :  { %v55_v2 = vld [vmem:[#allocation2] sm:$0xff]  ;;  %v66_v3 = vsub.f32 %v57_v0, %v60_v1  ;;  %v58_v4 = vld [vmem:[#allocation4] sm:$0xff]  ;;  %v61_v5 = vld [vmem:[#allocation6] sm:$0xff] }
  0x26   :  { %v56_v6 = vld [vmem:[#allocation2 + $0x8] sm:$0xff]  ;;  %v64_v7 = vsub.f32 %v55_v2, %v58_v4  ;;  %v67_v8 = vsub.f32 %v55_v2, %v61_v5  ;;  %v59_v9 = vld [vmem:[#allocation4 + $0x8] sm:$0xff]  ;;  %v62_v13 = vld [vmem:[#allocation6 + $0x8] sm:$0xff] }
  0x27   :  { %v63_v10 = vld [vmem:[#allocation6 + $0x10] sm:$0xff]  ;;  %v72_v11 = vmul.f32 %v66_v3, %v66_v3  ;;  %v65_v12 = vsub.f32 %v56_v6, %v59_v9  ;;  %v68_v18 = vsub.f32 %v56_v6, %v62_v13 }
  0x28   :  { %v70_v14 = vmul.f32 %v64_v7, %v64_v7  ;;  %v100_v15 = vmul.f32 %v67_v8, %v67_v8  ;;  %v69_v16 = vsub.f32 %v57_v0, %v63_v10 }
  0x29   :  { %77 = vadd.xlane.f32.xlu1 %v72_v11  ;;  %v71_v17 = vmul.f32 %v65_v12, %v65_v12  ;;  %v101_v20 = vmul.f32 %v68_v18, %v68_v18 }
  0x2a   :  { %73 = vadd.xlane.f32.xlu0 %v70_v14  ;;  %v102_v19 = vmul.f32 %v69_v16, %v69_v16 }
  0x2d   :  { %103 = vadd.xlane.f32.xlu1 %v100_v15 }
  0x2e   :  { %75 = vadd.xlane.f32.xlu0 %v71_v17 }
  0x31   :  { %107 = vadd.xlane.f32.xlu1 %v102_v19 }
  0x32   :  { %105 = vadd.xlane.f32.xlu0 %v101_v20 }
  0xb2   :  { %v78_v21 = vpop.xlane.xlu1 %77 }
  0xb3   :  { %v74_v22 = vpop.xlane.xlu0 %73  ;;  %vm95_vm0 = vcmp.eq.f32.partialorder %v78_v21, inf  ;;  %vm97_vm1 = vcmp.eq.f32.partialorder %v78_v21, 0.0  ;;  %v98_v33 = vand.u32 2147483648, %v78_v21 }
  0xb4   :  { %154 = vrsqrt.f32 %v74_v22  ;;  %vm81_vm2 = vcmp.eq.f32.partialorder %v74_v22, inf  ;;  %v84_v36 = vand.u32 2147483648, %v74_v22  ;;  %vm83_vm5 = vcmp.eq.f32.partialorder %v74_v22, 0.0 }
  0xb5   :  { %156 = vrsqrt.f32 %v78_v21 }
  0xb6   :  { %v104_v23 = vpop.xlane.xlu1 %103 }
  0xb7   :  { %158 = vrsqrt.f32 %v104_v23  ;;  %v76_v24 = vpop.xlane.xlu0 %75  ;;  %vm111_vm4 = vcmp.eq.f32.partialorder %v104_v23, inf  ;;  %v114_v37 = vand.u32 2147483648, %v104_v23  ;;  %vm113_vm6 = vcmp.eq.f32.partialorder %v104_v23, 0.0 }
  0xb8   :  { %160 = vrsqrt.f32 %v76_v24  ;;  %vm88_vm7 = vcmp.eq.f32.partialorder %v76_v24, inf  ;;  %vm90_vm8 = vcmp.eq.f32.partialorder %v76_v24, 0.0  ;;  %v91_v43 = vand.u32 2147483648, %v76_v24 }
  0xba   :  { %v108_v25 = vpop.xlane.xlu1 %107 }
  0xbb   :  { %162 = vrsqrt.f32 %v108_v25  ;;  %v106_v26 = vpop.xlane.xlu0 %105  ;;  %vm125_vm9 = vcmp.eq.f32.partialorder %v108_v25, inf  ;;  %vm127_vm10 = vcmp.eq.f32.partialorder %v108_v25, 0.0  ;;  %v128_v49 = vand.u32 2147483648, %v108_v25 }
  0xbc   :  { %164 = vrsqrt.f32 %v106_v26  ;;  %vm118_vm11 = vcmp.eq.f32.partialorder %v106_v26, inf  ;;  %v121_v53 = vand.u32 2147483648, %v106_v26  ;;  %vm120_vm12 = vcmp.eq.f32.partialorder %v106_v26, 0.0 }
  0xc1   :  { %v155_v27 = vpop.eup %154 }
  0xc2   :  { %v157_v28 = vpop.eup %156  ;;  %v80_v29 = vmul.f32 %v155_v27, %v74_v22 }
  0xc3   :  { %v94_v32 = vmul.f32 %v157_v28, %v78_v21 }
  0xc4   :  { %v159_v30 = vpop.eup %158  ;;  %v82_v34 = vsel %vm81_vm2, %v74_v22, %v80_v29 }
  0xc5   :  { %v161_v31 = vpop.eup %160  ;;  %v110_v35 = vmul.f32 %v159_v30, %v104_v23  ;;  %v85_v41 = vsel %vm83_vm5, %v84_v36, %v82_v34  ;;  %v96_v45 = vsel %vm95_vm0, %v78_v21, %v94_v32 }
  0xc6   :  { %v87_v38 = vmul.f32 %v161_v31, %v76_v24  ;;  %v99_v54 = vsel %vm97_vm1, %v98_v33, %v96_v45 }
  0xc7   :  { %v112_v39 = vsel %vm111_vm4, %v104_v23, %v110_v35 }
  0xc8   :  { %v163_v40 = vpop.eup %162  ;;  %v115_v42 = vsel %vm113_vm6, %v114_v37, %v112_v39  ;;  %v89_v48 = vsel %vm88_vm7, %v76_v24, %v87_v38 }
  0xc9   :  { %v165_v44 = vpop.eup %164  ;;  %v130_v46 = vsub.f32 %v85_v41, %v115_v42  ;;  %v124_v47 = vmul.f32 %v163_v40, %v108_v25  ;;  %v92_v59 = vsel %vm90_vm8, %v91_v43, %v89_v48 }
  0xca   :  { %v117_v50 = vmul.f32 %v165_v44, %v106_v26 }
  0xcb   :  { %v133_v51 = vadd.f32 1.0, %v130_v46  ;;  %v126_v52 = vsel %vm125_vm9, %v108_v25, %v124_v47 }
  0xcc   :  { %v129_v55 = vsel %vm127_vm10, %v128_v49, %v126_v52  ;;  %v119_v56 = vsel %vm118_vm11, %v106_v26, %v117_v50 }
  0xcd   :  { %v136_v57 = vmax.f32 %v133_v51, 0.0  ;;  %v132_v58 = vsub.f32 %v99_v54, %v129_v55  ;;  %v122_v60 = vsel %vm120_vm12, %v121_v53, %v119_v56 }
  0xce   :  { %v131_v61 = vsub.f32 %v92_v59, %v122_v60 }
  0xcf   :  { %v135_v62 = vadd.f32 1.0, %v132_v58  ;;  %140 = vst.msk [vmem:[%s282_s3] sm:$0xff] %vm139_vm3, %v136_v57 }
  0xd0   :  { %v134_v63 = vadd.f32 1.0, %v131_v61 }
  0xd1   :  { %v138_v0 = vmax.f32 %v135_v62, 0.0 }
  0xd2   :  { %v137_v1 = vmax.f32 %v134_v63, 0.0 }
  0xd3   :  { %142 = vst.msk [vmem:[%s282_s3 + $0x10] sm:$0xff] %vm139_vm3, %v138_v0 }
  0xd4   :  { %141 = vst.msk [vmem:[%s282_s3 + $0x8] sm:$0xff] %vm139_vm3, %v137_v1 }
  0xd5   :  { %147 = vsyncpa [#allocation3], 1 }
  0xd6   :  { %148 = vsyncpa [#allocation5], 1 }

</bundles_post_ra>
